<compile_context>
chip_gen: v6e
topology: v6e:2x2x1
jax: 0.10.0
libtpu: 0.0.40
codegen_flags: <defaults>
</compile_context>

<pallas_src>
import numpy as np
import jax
import jax.numpy as jnp
from jax.experimental import pallas as pl
from jax.experimental.pallas import tpu as pltpu

_VMEM = pl.BlockSpec(memory_space=pltpu.MemorySpace.VMEM)
_OUT_LANES = 128  # lane-dense output width (true logit is column 0)


# ----------------------------- Fused Pallas kernel ---------------------------

def make_fused_gin_kernel(num_layers, hidden):
    L, H = num_layers, hidden

    def kernel(a_ref, x_ref, bmat_ref, w_ref, bias_ref, hw_ref, c3_ref, out_ref):
        a = a_ref[...]          # [N, N]   A + (1+eps) * I
        bmat = bmat_ref[...]    # [G, N]   one-hot graph-assignment (pooling)
        x = x_ref[...]          # [N, H]   node features, zero-padded to H lanes
        bias = bias_ref[...]    # [2L+2, H] b1f_0, b2_0, ..., b1f_{L-1}, b2_{L-1}, cls1_b, cls2_b

        z1 = None  # running first-head-layer pre-activation (replaces JK concat)
        for l in range(L):
            # Static, 8-aligned sublane slices of the packed weight slabs.
            w1 = w_ref[pl.ds((2 * l) * H, H), :]       # [H, H]  Linear1 with BN folded
            w2 = w_ref[pl.ds((2 * l + 1) * H, H), :]   # [H, H]  Linear2
            b1 = bias[2 * l:2 * l + 1, :]              # [1, H]
            b2 = bias[2 * l + 1:2 * l + 2, :]          # [1, H]

            # GIN aggregation (self term folded into a): (1+eps)*x + sum_j x_j
            h = jnp.dot(a, x, preferred_element_type=jnp.float32)
            # MLP: Linear(+BN eval, folded) -> ReLU -> Linear ; dropout = identity (eval)
            h = jnp.maximum(jnp.dot(h, w1, preferred_element_type=jnp.float32) + b1, 0.0)
            h = jnp.dot(h, w2, preferred_element_type=jnp.float32) + b2
            # outer F.relu
            x = jnp.maximum(h, 0.0)

            # scatter(X, batch, 'sum') == B @ X ; consume immediately into the
            # matching cls1 weight chunk (mathematically == concat + cls1).
            pooled = jnp.dot(bmat, x, preferred_element_type=jnp.float32)      # [G, H]
            c1_chunk = hw_ref[pl.ds(l * H, H), :]                               # [H, H]
            contrib = jnp.dot(pooled, c1_chunk, preferred_element_type=jnp.float32)
            z1 = contrib if z1 is None else z1 + contrib

        cls1_b = bias[2 * L:2 * L + 1, :]
        cls2_b = bias[2 * L + 1:2 * L + 2, :]

        z = jnp.maximum(z1 + cls1_b, 0.0)
        c2_w = hw_ref[pl.ds(L * H, H), :]                                       # [H, H]
        z = jnp.maximum(jnp.dot(z, c2_w, preferred_element_type=jnp.float32) + cls2_b, 0.0)

        # Lane-dense final store: cls3 padded to 128 lanes, bias in row H.
        c3_w = c3_ref[pl.ds(0, H), :]     # [H, 128]
        c3_b = c3_ref[pl.ds(H, 1), :]     # [1, 128]
        out_ref[...] = jnp.dot(z, c3_w, preferred_element_type=jnp.float32) + c3_b

    return kernel


# --------------------------- Host-side packing --------------------------------

def pack_inputs(X, A, B, params, gin_eps=0.0, bn_eps=1e-5):
    """Build the 7 packed operands (slabs) consumed by the fused kernel."""
    N, f_in = X.shape
    H = params["cls2_W"].shape[0]
    L = len(params["gin_layers"])
    assert f_in <= H, "feature-padding scheme assumes F_IN <= hidden_channels"

    # Fold the GIN self-loop into the adjacency (exact for any fixed eps).
    A_hat = A + (1.0 + gin_eps) * jnp.eye(N, dtype=jnp.float32)
    # Zero-pad raw features so every layer's input width is H.
    X_pad = jnp.zeros((N, H), jnp.float32).at[:, :f_in].set(X)

    w_blocks, b_rows = [], []
    for layer in params["gin_layers"]:
        # General eval-mode BatchNorm fold into the first Linear.
        scale = layer["gamma"] / jnp.sqrt(layer["running_var"] + bn_eps)
        W1f = layer["W1"] * scale
        b1f = (layer["b1"] - layer["running_mean"]) * scale + layer["beta"]
        fin = W1f.shape[0]
        W1p = jnp.zeros((H, H), jnp.float32).at[:fin, :].set(W1f)
        w_blocks += [W1p, layer["W2"]]
        b_rows += [b1f.reshape(1, H), layer["b2"].reshape(1, H)]

    w_slab = jnp.concatenate(w_blocks, axis=0)                                   # [2*L*H, H]
    bias_slab = jnp.concatenate(
        b_rows + [params["cls1_b"].reshape(1, H), params["cls2_b"].reshape(1, H)],
        axis=0)                                                                  # [2L+2, H]
    head_w_slab = jnp.concatenate([params["cls1_W"], params["cls2_W"]], axis=0)  # [(L+1)*H, H]

    cls3_slab = jnp.zeros((H + 1, _OUT_LANES), jnp.float32)
    cls3_slab = cls3_slab.at[:H, :1].set(params["cls3_W"])
    cls3_slab = cls3_slab.at[H, 0].set(jnp.squeeze(params["cls3_b"]))            # [H+1, 128]

    return A_hat, X_pad, B.astype(jnp.float32), w_slab, bias_slab, head_w_slab, cls3_slab


def barebone_gin_forward(X, A, B, params, gin_eps=0.0, bn_eps=1e-5):
    """Full BareboneGIN forward pass (eval mode) as ONE fused Pallas call."""
    G = B.shape[0]
    H = params["cls2_W"].shape[0]
    L = len(params["gin_layers"])

    inputs = pack_inputs(X, A, B, params, gin_eps, bn_eps)
    kernel = make_fused_gin_kernel(L, H)
    out = pl.pallas_call(
        kernel,
        out_shape=jax.ShapeDtypeStruct((G, _OUT_LANES), jnp.float32),
        in_specs=[_VMEM] * len(inputs),
        out_specs=_VMEM,
    )(*inputs)
    return out[:, :1]


# -------------------------- Pure-JAX reference --------------------------------
# Uses UNFOLDED BatchNorm, raw A (no self-loop fold), raw X and raw cls3 to
# independently verify every packing / folding step done for the kernel.

def reference_forward(X, A, B, params, gin_eps=0.0, bn_eps=1e-5):
    xs = []
    for layer in params["gin_layers"]:
        h = (1.0 + gin_eps) * X + A @ X
        h = h @ layer["W1"] + layer["b1"]
        h = (h - layer["running_mean"]) / jnp.sqrt(layer["running_var"] + bn_eps)
        h = h * layer["gamma"] + layer["beta"]          # eval-mode BN affine
        h = jnp.maximum(h, 0.0)
        h = h @ layer["W2"] + layer["b2"]
        X = jnp.maximum(h, 0.0)
        xs.append(B @ X)
    h = jnp.concatenate(xs, axis=1)
    h = jnp.maximum(h @ params["cls1_W"] + params["cls1_b"], 0.0)
    h = jnp.maximum(h @ params["cls2_W"] + params["cls2_b"], 0.0)
    return h @ params["cls3_W"] + params["cls3_b"]


# ------------------------------- Main ------------------------------------------

def _linear_params(key, fin, fout, scale=0.1):
    kw, kb = jax.random.split(key)
    W = jax.random.normal(kw, (fin, fout), jnp.float32) * scale
    b = jax.random.normal(kb, (1, fout), jnp.float32) * scale
    return W, b


if __name__ == "__main__":
    # Problem sizes (small, consistent with the module)
    N = 64          # nodes
    F_IN = 16       # raw node feature dim (lazy in_channels = -1 in torch)
    H = 32          # hidden_channels
    L = 3           # num_layers
    G = 4           # number of graphs in the batch
    E = 256         # number of (directed) edges
    NODES_PER_GRAPH = N // G
    GIN_EPS = 0.0   # PyG GINConv default, train_eps=False
    BN_EPS = 1e-5

    key = jax.random.PRNGKey(0)
    kx, ke1, ke2, kp = jax.random.split(key, 4)

    # Node features
    X = jax.random.normal(kx, (N, F_IN), jnp.float32)

    # Deterministic random edges (kept within each graph), edge_index = [2, E]
    egraph = jax.random.randint(ke1, (E,), 0, G)
    esrc_local = jax.random.randint(ke2, (E,), 0, NODES_PER_GRAPH)
    edst_local = jax.random.randint(jax.random.fold_in(ke2, 1), (E,), 0, NODES_PER_GRAPH)
    src = egraph * NODES_PER_GRAPH + esrc_local
    dst = egraph * NODES_PER_GRAPH + edst_local
    edge_index = jnp.stack([src, dst], axis=0)

    # batch vector: node -> graph id
    batch = jnp.arange(N) // NODES_PER_GRAPH

    # Dense adjacency A[dst, src] (scatter-add message passing) and pooling B[g, n]
    A = jnp.zeros((N, N), jnp.float32).at[edge_index[1], edge_index[0]].add(1.0)
    B = jnp.zeros((G, N), jnp.float32).at[batch, jnp.arange(N)].set(1.0)

    # ---------------- Deterministic parameter init ----------------
    keys = jax.random.split(kp, 4 * L + 3)
    gin_layers = []
    for i in range(L):
        fin = F_IN if i == 0 else H
        W1, b1 = _linear_params(keys[4 * i + 0], fin, H)
        W2, b2 = _linear_params(keys[4 * i + 1], H, H)
        # Non-trivial BatchNorm eval-mode statistics/affine (exercises the fold).
        kg, kb_ = jax.random.split(keys[4 * i + 2])
        km, kv = jax.random.split(keys[4 * i + 3])
        gamma = 1.0 + 0.1 * jax.random.normal(kg, (1, H), jnp.float32)
        beta = 0.1 * jax.random.normal(kb_, (1, H), jnp.float32)
        running_mean = 0.1 * jax.random.normal(km, (1, H), jnp.float32)
        running_var = 1.0 + 0.25 * jax.random.uniform(kv, (1, H), jnp.float32)
        gin_layers.append(dict(W1=W1, b1=b1, W2=W2, b2=b2,
                               gamma=gamma, beta=beta,
                               running_mean=running_mean, running_var=running_var))

    cls1_W, cls1_b = _linear_params(keys[4 * L + 0], H * L, H)
    cls2_W, cls2_b = _linear_params(keys[4 * L + 1], H, H)
    cls3_W, cls3_b = _linear_params(keys[4 * L + 2], H, 1)

    params = dict(gin_layers=gin_layers,
                  cls1_W=cls1_W, cls1_b=cls1_b,
                  cls2_W=cls2_W, cls2_b=cls2_b,
                  cls3_W=cls3_W, cls3_b=cls3_b)

    # ---------------- Run fused Pallas kernel ----------------
    logits = barebone_gin_forward(X, A, B, params, gin_eps=GIN_EPS, bn_eps=BN_EPS)
    logits = jax.block_until_ready(logits)

    # Sanity check against pure-JAX reference (unfolded BN, unfused graph ops)
    ref = jax.block_until_ready(reference_forward(X, A, B, params, GIN_EPS, BN_EPS))
    np.testing.assert_allclose(np.asarray(logits), np.asarray(ref), rtol=1e-4, atol=1e-4)
    assert logits.shape == (G, 1)

    print("KERNEL_OK")
</pallas_src>

<mosaic_0001>
module attributes {stable_mosaic.version = 11 : i64} {
  func.func @kernel(%arg0: memref<64x64xf32, #tpu.memory_space<vmem>>, %arg1: memref<64x32xf32, #tpu.memory_space<vmem>>, %arg2: memref<4x64xf32, #tpu.memory_space<vmem>>, %arg3: memref<192x32xf32, #tpu.memory_space<vmem>>, %arg4: memref<8x32xf32, #tpu.memory_space<vmem>>, %arg5: memref<128x32xf32, #tpu.memory_space<vmem>>, %arg6: memref<33x128xf32, #tpu.memory_space<vmem>>, %arg7: memref<4x128xf32, #tpu.memory_space<vmem>>) attributes {dimension_semantics = [], scalar_prefetch = 0 : i64, scratch_operands = 0 : i64, tpu.core_type = #tpu.core_type<tc>} {
    %c0 = arith.constant 0 : index
    %c0_0 = arith.constant 0 : index
    %0 = vector.load %arg0[%c0, %c0_0] : memref<64x64xf32, #tpu.memory_space<vmem>>, vector<64x64xf32>
    %c0_1 = arith.constant 0 : index
    %c0_2 = arith.constant 0 : index
    %1 = vector.load %arg2[%c0_1, %c0_2] : memref<4x64xf32, #tpu.memory_space<vmem>>, vector<4x64xf32>
    %c0_3 = arith.constant 0 : index
    %c0_4 = arith.constant 0 : index
    %2 = vector.load %arg1[%c0_3, %c0_4] : memref<64x32xf32, #tpu.memory_space<vmem>>, vector<64x32xf32>
    %c0_5 = arith.constant 0 : index
    %c0_6 = arith.constant 0 : index
    %3 = vector.load %arg4[%c0_5, %c0_6] : memref<8x32xf32, #tpu.memory_space<vmem>>, vector<8x32xf32>
    %c0_7 = arith.constant 0 : index
    %c0_8 = arith.constant 0 : index
    %4 = vector.load %arg3[%c0_7, %c0_8] : memref<192x32xf32, #tpu.memory_space<vmem>>, vector<32x32xf32>
    %c32 = arith.constant 32 : index
    %c0_9 = arith.constant 0 : index
    %5 = vector.load %arg3[%c32, %c0_9] : memref<192x32xf32, #tpu.memory_space<vmem>>, vector<32x32xf32>
    %6 = vector.extract_strided_slice %3 {offsets = [0, 0], sizes = [1, 32], strides = [1, 1]} : vector<8x32xf32> to vector<1x32xf32>
    %7 = vector.extract_strided_slice %3 {offsets = [1, 0], sizes = [1, 32], strides = [1, 1]} : vector<8x32xf32> to vector<1x32xf32>
    %cst = arith.constant dense<0.000000e+00> : vector<64x32xf32>
    %8 = tpu.matmul %0, %2, %cst {dimension_numbers = #tpu.dot_dimension_numbers<[1], [0], [0], [1], [0, 0, 1, 1], [], []>} : vector<64x64xf32>, vector<64x32xf32>, vector<64x32xf32> -> vector<64x32xf32>
    %cst_10 = arith.constant dense<0.000000e+00> : vector<64x32xf32>
    %9 = tpu.matmul %8, %4, %cst_10 {dimension_numbers = #tpu.dot_dimension_numbers<[1], [0], [0], [1], [0, 0, 1, 1], [], []>} : vector<64x32xf32>, vector<32x32xf32>, vector<64x32xf32> -> vector<64x32xf32>
    %10 = vector.broadcast %6 : vector<1x32xf32> to vector<64x32xf32>
    %11 = arith.addf %9, %10 : vector<64x32xf32>
    %cst_11 = arith.constant 0.000000e+00 : f32
    %12 = vector.broadcast %cst_11 : f32 to vector<64x32xf32>
    %13 = arith.maximumf %11, %12 : vector<64x32xf32>
    %cst_12 = arith.constant dense<0.000000e+00> : vector<64x32xf32>
    %14 = tpu.matmul %13, %5, %cst_12 {dimension_numbers = #tpu.dot_dimension_numbers<[1], [0], [0], [1], [0, 0, 1, 1], [], []>} : vector<64x32xf32>, vector<32x32xf32>, vector<64x32xf32> -> vector<64x32xf32>
    %15 = vector.broadcast %7 : vector<1x32xf32> to vector<64x32xf32>
    %16 = arith.addf %14, %15 : vector<64x32xf32>
    %cst_13 = arith.constant 0.000000e+00 : f32
    %17 = vector.broadcast %cst_13 : f32 to vector<64x32xf32>
    %18 = arith.maximumf %16, %17 : vector<64x32xf32>
    %cst_14 = arith.constant dense<0.000000e+00> : vector<4x32xf32>
    %19 = tpu.matmul %1, %18, %cst_14 {dimension_numbers = #tpu.dot_dimension_numbers<[1], [0], [0], [1], [0, 0, 1, 1], [], []>} : vector<4x64xf32>, vector<64x32xf32>, vector<4x32xf32> -> vector<4x32xf32>
    %c0_15 = arith.constant 0 : index
    %c0_16 = arith.constant 0 : index
    %20 = vector.load %arg5[%c0_15, %c0_16] : memref<128x32xf32, #tpu.memory_space<vmem>>, vector<32x32xf32>
    %cst_17 = arith.constant dense<0.000000e+00> : vector<4x32xf32>
    %21 = tpu.matmul %19, %20, %cst_17 {dimension_numbers = #tpu.dot_dimension_numbers<[1], [0], [0], [1], [0, 0, 1, 1], [], []>} : vector<4x32xf32>, vector<32x32xf32>, vector<4x32xf32> -> vector<4x32xf32>
    %c64 = arith.constant 64 : index
    %c0_18 = arith.constant 0 : index
    %22 = vector.load %arg3[%c64, %c0_18] : memref<192x32xf32, #tpu.memory_space<vmem>>, vector<32x32xf32>
    %c96 = arith.constant 96 : index
    %c0_19 = arith.constant 0 : index
    %23 = vector.load %arg3[%c96, %c0_19] : memref<192x32xf32, #tpu.memory_space<vmem>>, vector<32x32xf32>
    %24 = vector.extract_strided_slice %3 {offsets = [2, 0], sizes = [1, 32], strides = [1, 1]} : vector<8x32xf32> to vector<1x32xf32>
    %25 = vector.extract_strided_slice %3 {offsets = [3, 0], sizes = [1, 32], strides = [1, 1]} : vector<8x32xf32> to vector<1x32xf32>
    %cst_20 = arith.constant dense<0.000000e+00> : vector<64x32xf32>
    %26 = tpu.matmul %0, %18, %cst_20 {dimension_numbers = #tpu.dot_dimension_numbers<[1], [0], [0], [1], [0, 0, 1, 1], [], []>} : vector<64x64xf32>, vector<64x32xf32>, vector<64x32xf32> -> vector<64x32xf32>
    %cst_21 = arith.constant dense<0.000000e+00> : vector<64x32xf32>
    %27 = tpu.matmul %26, %22, %cst_21 {dimension_numbers = #tpu.dot_dimension_numbers<[1], [0], [0], [1], [0, 0, 1, 1], [], []>} : vector<64x32xf32>, vector<32x32xf32>, vector<64x32xf32> -> vector<64x32xf32>
    %28 = vector.broadcast %24 : vector<1x32xf32> to vector<64x32xf32>
    %29 = arith.addf %27, %28 : vector<64x32xf32>
    %cst_22 = arith.constant 0.000000e+00 : f32
    %30 = vector.broadcast %cst_22 : f32 to vector<64x32xf32>
    %31 = arith.maximumf %29, %30 : vector<64x32xf32>
    %cst_23 = arith.constant dense<0.000000e+00> : vector<64x32xf32>
    %32 = tpu.matmul %31, %23, %cst_23 {dimension_numbers = #tpu.dot_dimension_numbers<[1], [0], [0], [1], [0, 0, 1, 1], [], []>} : vector<64x32xf32>, vector<32x32xf32>, vector<64x32xf32> -> vector<64x32xf32>
    %33 = vector.broadcast %25 : vector<1x32xf32> to vector<64x32xf32>
    %34 = arith.addf %32, %33 : vector<64x32xf32>
    %cst_24 = arith.constant 0.000000e+00 : f32
    %35 = vector.broadcast %cst_24 : f32 to vector<64x32xf32>
    %36 = arith.maximumf %34, %35 : vector<64x32xf32>
    %cst_25 = arith.constant dense<0.000000e+00> : vector<4x32xf32>
    %37 = tpu.matmul %1, %36, %cst_25 {dimension_numbers = #tpu.dot_dimension_numbers<[1], [0], [0], [1], [0, 0, 1, 1], [], []>} : vector<4x64xf32>, vector<64x32xf32>, vector<4x32xf32> -> vector<4x32xf32>
    %c32_26 = arith.constant 32 : index
    %c0_27 = arith.constant 0 : index
    %38 = vector.load %arg5[%c32_26, %c0_27] : memref<128x32xf32, #tpu.memory_space<vmem>>, vector<32x32xf32>
    %cst_28 = arith.constant dense<0.000000e+00> : vector<4x32xf32>
    %39 = tpu.matmul %37, %38, %cst_28 {dimension_numbers = #tpu.dot_dimension_numbers<[1], [0], [0], [1], [0, 0, 1, 1], [], []>} : vector<4x32xf32>, vector<32x32xf32>, vector<4x32xf32> -> vector<4x32xf32>
    %40 = arith.addf %21, %39 : vector<4x32xf32>
    %c128 = arith.constant 128 : index
    %c0_29 = arith.constant 0 : index
    %41 = vector.load %arg3[%c128, %c0_29] : memref<192x32xf32, #tpu.memory_space<vmem>>, vector<32x32xf32>
    %c160 = arith.constant 160 : index
    %c0_30 = arith.constant 0 : index
    %42 = vector.load %arg3[%c160, %c0_30] : memref<192x32xf32, #tpu.memory_space<vmem>>, vector<32x32xf32>
    %43 = vector.extract_strided_slice %3 {offsets = [4, 0], sizes = [1, 32], strides = [1, 1]} : vector<8x32xf32> to vector<1x32xf32>
    %44 = vector.extract_strided_slice %3 {offsets = [5, 0], sizes = [1, 32], strides = [1, 1]} : vector<8x32xf32> to vector<1x32xf32>
    %cst_31 = arith.constant dense<0.000000e+00> : vector<64x32xf32>
    %45 = tpu.matmul %0, %36, %cst_31 {dimension_numbers = #tpu.dot_dimension_numbers<[1], [0], [0], [1], [0, 0, 1, 1], [], []>} : vector<64x64xf32>, vector<64x32xf32>, vector<64x32xf32> -> vector<64x32xf32>
    %cst_32 = arith.constant dense<0.000000e+00> : vector<64x32xf32>
    %46 = tpu.matmul %45, %41, %cst_32 {dimension_numbers = #tpu.dot_dimension_numbers<[1], [0], [0], [1], [0, 0, 1, 1], [], []>} : vector<64x32xf32>, vector<32x32xf32>, vector<64x32xf32> -> vector<64x32xf32>
    %47 = vector.broadcast %43 : vector<1x32xf32> to vector<64x32xf32>
    %48 = arith.addf %46, %47 : vector<64x32xf32>
    %cst_33 = arith.constant 0.000000e+00 : f32
    %49 = vector.broadcast %cst_33 : f32 to vector<64x32xf32>
    %50 = arith.maximumf %48, %49 : vector<64x32xf32>
    %cst_34 = arith.constant dense<0.000000e+00> : vector<64x32xf32>
    %51 = tpu.matmul %50, %42, %cst_34 {dimension_numbers = #tpu.dot_dimension_numbers<[1], [0], [0], [1], [0, 0, 1, 1], [], []>} : vector<64x32xf32>, vector<32x32xf32>, vector<64x32xf32> -> vector<64x32xf32>
    %52 = vector.broadcast %44 : vector<1x32xf32> to vector<64x32xf32>
    %53 = arith.addf %51, %52 : vector<64x32xf32>
    %cst_35 = arith.constant 0.000000e+00 : f32
    %54 = vector.broadcast %cst_35 : f32 to vector<64x32xf32>
    %55 = arith.maximumf %53, %54 : vector<64x32xf32>
    %cst_36 = arith.constant dense<0.000000e+00> : vector<4x32xf32>
    %56 = tpu.matmul %1, %55, %cst_36 {dimension_numbers = #tpu.dot_dimension_numbers<[1], [0], [0], [1], [0, 0, 1, 1], [], []>} : vector<4x64xf32>, vector<64x32xf32>, vector<4x32xf32> -> vector<4x32xf32>
    %c64_37 = arith.constant 64 : index
    %c0_38 = arith.constant 0 : index
    %57 = vector.load %arg5[%c64_37, %c0_38] : memref<128x32xf32, #tpu.memory_space<vmem>>, vector<32x32xf32>
    %cst_39 = arith.constant dense<0.000000e+00> : vector<4x32xf32>
    %58 = tpu.matmul %56, %57, %cst_39 {dimension_numbers = #tpu.dot_dimension_numbers<[1], [0], [0], [1], [0, 0, 1, 1], [], []>} : vector<4x32xf32>, vector<32x32xf32>, vector<4x32xf32> -> vector<4x32xf32>
    %59 = arith.addf %40, %58 : vector<4x32xf32>
    %60 = vector.extract_strided_slice %3 {offsets = [6, 0], sizes = [1, 32], strides = [1, 1]} : vector<8x32xf32> to vector<1x32xf32>
    %61 = vector.extract_strided_slice %3 {offsets = [7, 0], sizes = [1, 32], strides = [1, 1]} : vector<8x32xf32> to vector<1x32xf32>
    %62 = vector.broadcast %60 : vector<1x32xf32> to vector<4x32xf32>
    %63 = arith.addf %59, %62 : vector<4x32xf32>
    %cst_40 = arith.constant 0.000000e+00 : f32
    %64 = vector.broadcast %cst_40 : f32 to vector<4x32xf32>
    %65 = arith.maximumf %63, %64 : vector<4x32xf32>
    %c96_41 = arith.constant 96 : index
    %c0_42 = arith.constant 0 : index
    %66 = vector.load %arg5[%c96_41, %c0_42] : memref<128x32xf32, #tpu.memory_space<vmem>>, vector<32x32xf32>
    %cst_43 = arith.constant dense<0.000000e+00> : vector<4x32xf32>
    %67 = tpu.matmul %65, %66, %cst_43 {dimension_numbers = #tpu.dot_dimension_numbers<[1], [0], [0], [1], [0, 0, 1, 1], [], []>} : vector<4x32xf32>, vector<32x32xf32>, vector<4x32xf32> -> vector<4x32xf32>
    %68 = vector.broadcast %61 : vector<1x32xf32> to vector<4x32xf32>
    %69 = arith.addf %67, %68 : vector<4x32xf32>
    %cst_44 = arith.constant 0.000000e+00 : f32
    %70 = vector.broadcast %cst_44 : f32 to vector<4x32xf32>
    %71 = arith.maximumf %69, %70 : vector<4x32xf32>
    %c0_45 = arith.constant 0 : index
    %c0_46 = arith.constant 0 : index
    %72 = vector.load %arg6[%c0_45, %c0_46] : memref<33x128xf32, #tpu.memory_space<vmem>>, vector<32x128xf32>
    %c32_47 = arith.constant 32 : index
    %c0_48 = arith.constant 0 : index
    %73 = vector.load %arg6[%c32_47, %c0_48] : memref<33x128xf32, #tpu.memory_space<vmem>>, vector<1x128xf32>
    %cst_49 = arith.constant dense<0.000000e+00> : vector<4x128xf32>
    %74 = tpu.matmul %71, %72, %cst_49 {dimension_numbers = #tpu.dot_dimension_numbers<[1], [0], [0], [1], [0, 0, 1, 1], [], []>} : vector<4x32xf32>, vector<32x128xf32>, vector<4x128xf32> -> vector<4x128xf32>
    %75 = vector.broadcast %73 : vector<1x128xf32> to vector<4x128xf32>
    %76 = arith.addf %74, %75 : vector<4x128xf32>
    %c0_50 = arith.constant 0 : index
    %c0_51 = arith.constant 0 : index
    %77 = vector.load %arg7[%c0_50, %c0_51] : memref<4x128xf32, #tpu.memory_space<vmem>>, vector<4x128xf32>
    tpu.vector_store %arg7[%c0_50, %c0_51], %76 {strides = array<i32>} : memref<4x128xf32, #tpu.memory_space<vmem>>, vector<4x128xf32>,
    return
  }
}

</mosaic_0001>

<bundles_post_ra>
// kernel: tpu_custom_call.1
= control target key start
LH: loop header
LB: loop body
LE: loop exit
PB: predicated region body
PF: predicated region fallthrough
CT: control target
= control target key end

     0   :  { %vm53_vm0 = vcmask 523264   ;;  %s2929_s0 = inlined_call_operand.vmem [shape: f32[64,64], index: 0, kind: input, shape index: {}]   ;;  %s2930_s1 = inlined_call_operand.vmem [shape: f32[64,32], index: 1, kind: input, shape index: {}]   ;;  %s2931_s2 = inlined_call_operand.vmem [shape: f32[4,64], index: 2, kind: input, shape index: {}]   ;;  %s2932_s3 = inlined_call_operand.vmem [shape: f32[192,32], index: 3, kind: input, shape index: {}]   ;;  %s2933_s4 = inlined_call_operand.vmem [shape: f32[8,32], index: 4, kind: input, shape index: {}]   ;;  %s2934_s5 = inlined_call_operand.vmem [shape: f32[128,32], index: 5, kind: input, shape index: {}]   ;;  %s2935_s6 = inlined_call_operand.vmem [shape: f32[33,128], index: 6, kind: input, shape index: {}]   ;;  %s2936_s7 = inlined_call_operand.hbm [shape: f32[4,128], index: 7, kind: output, shape index: {}]  }
   0x1   :  { %v43_v0 = vld [vmem:[%s2930_s1 + $0x38] sm:$0xff]  ;;  %v42_v1 = vld [vmem:[%s2930_s1 + $0x30] sm:$0xff]  ;;  %v41_v2 = vld [vmem:[%s2930_s1 + $0x28] sm:$0xff] }
   0x2   :  { %2139 = vmatprep.subr.mxu0 %v43_v0  ;;  %v2535_v3 = vld [vmem:[%s2929_s0] sm:$0xff]  ;;  %v48_v5 = vld [vmem:[%s2932_s3 + $0x18] sm:$0xff]  ;;  %v47_v6 = vld [vmem:[%s2932_s3 + $0x10] sm:$0xff] }
   0x3   :  { %2140 = vmatpush3.msra.mxu0 %v43_v0  ;;  %2155 = vmatprep.mubr.msk.f32.mxu0 %vm53_vm0, %v2535_v3  ;;  %v40_v4 = vld [vmem:[%s2930_s1 + $0x20] sm:$0xff]  ;;  %v39_v7 = vld [vmem:[%s2930_s1 + $0x18] sm:$0xff] }
   0x4   :  { %2141 = vmatprep.subr.mxu0 %v42_v1  ;;  %2167 = vmatprep.subr.mxu1 %v48_v5 }
   0x5   :  { %2142 = vmatpush3.msra.mxu0 %v42_v1 }
   0x6   :  { %2143 = vmatprep.subr.mxu0 %v41_v2 }
   0x7   :  { %2144 = vmatpush3.msra.mxu0 %v41_v2 }
   0x8   :  { %12 = vsyncpa [#allocation3], 0  ;;  %2145 = vmatprep.subr.mxu0 %v40_v4  ;;  %2168 = vmatpush3.msra.mxu1 %v48_v5  ;;  %v38_v8 = vld [vmem:[%s2930_s1 + $0x10] sm:$0xff]  ;;  %v37_v9 = vld [vmem:[%s2930_s1 + $0x8] sm:$0xff]  ;;  %vm187_vm1 = vcmask 261120   ;;  %v183_v32 = vlaneseq  ;;  %v2480_v61 = vmov 0.0  }
   0x9   :  { %2146 = vmatpush3.msra.mxu0 %v40_v4  ;;  %2169 = vmatprep.subr.mxu1 %v47_v6  ;;  %v36_v10 = vld [vmem:[%s2930_s1] sm:$0xff]  ;;  %v2563_v11 = vld [vmem:[%s2929_s0 + $0x8] sm:$0xff]  ;;  %v2568_v12 = vld [vmem:[%s2929_s0 + $0x10] sm:$0xff]  ;;  %vm2481_vm2 = vmmov 0   ;;  %s2482_s19 = smov [#allocation2]  }
   0xa   :  { %2147 = vmatprep.subr.mxu0 %v39_v7  ;;  %2170 = vmatpush3.msra.mxu1 %v47_v6  ;;  %v2577_v13 = vld [vmem:[%s2929_s0 + $0x18] sm:$0xff]  ;;  %v2582_v14 = vld [vmem:[%s2929_s0 + $0x20] sm:$0xff]  ;;  %v2591_v15 = vld [vmem:[%s2929_s0 + $0x28] sm:$0xff]  ;;  %v2635_v33 = vshrl.u32 %v183_v32, 7  ;;  %s1878_s20 = sshll.u32 %s2482_s19, 4  ;;  %s1879_s20 = int_to_ptr.vmem [resolvable:$true] %s1878_s20 }
   0xb   :  { %2148 = vmatpush3.msra.mxu0 %v39_v7  ;;  %v2596_v16 = vld [vmem:[%s2929_s0 + $0x30] sm:$0xff]  ;;  %v2605_v17 = vld [vmem:[%s2929_s0 + $0x38] sm:$0xff]  ;;  %v46_v18 = vld [vmem:[%s2932_s3 + $0x8] sm:$0xff]  ;;  %s2458_s21 = scalar_lea.vmem %s1879_s20, 64  ;;  %p2463_p1 = scmp.lt.s32.totalorder %s1879_s20, %s1879_s20 }
   0xc   :  { %2149 = vmatprep.subr.mxu0 %v38_v8  ;;  %2171 = vmatprep.subr.mxu1 %v46_v18  ;;  %v45_v19 = vld [vmem:[%s2932_s3] sm:$0xff]  ;;  %v52_v20 = vld [vmem:[%s2932_s3 + $0x38] sm:$0xff]  ;;  %v51_v23 = vld [vmem:[%s2932_s3 + $0x30] sm:$0xff]  ;;  %v185_v34 = vsub.s32 0, %v2635_v33  ;;  %v327_v2 = vsub.s32 1, %v2635_v33  ;;  %p2459_p0 = scmp.ne.s32.totalorder %s1879_s20, %s2458_s21  ;;  %p2464_p2 = scmp.lt.s32.totalorder %s2458_s21, %s2458_s21 }
   0xd   :  { %2150 = vmatpush3.msra.mxu0 %v38_v8  ;;  %2172 = vmatpush3.msra.mxu1 %v46_v18  ;;  %v50_v30 = vld [vmem:[%s2932_s3 + $0x28] sm:$0xff]  ;;  %v49_v31 = vld [vmem:[%s2932_s3 + $0x20] sm:$0xff] }
   0xe   :  { %2151 = vmatprep.subr.mxu0 %v37_v9  ;;  %2173 = vmatprep.subr.mxu1 %v45_v19  ;;  %v2641_v35 = vld [vmem:[%s2933_s4] sm:$0xff]  ;;  %p2465_p3 = por %p2464_p2, %p2463_p1 }
   0xf   :  { %2152 = vmatpush3.msra.mxu0 %v37_v9  ;;  %2174 = vmatpush3.msra.mxu1 %v45_v19  ;;  %v186_v36 = vrot.slane %v2641_v35, %v185_v34  ;;  %v328_v6 = vrot.slane %v2641_v35, %v327_v2  ;;  %v2668_v32 = vld [vmem:[%s2931_s2] sm:$0xf]  ;;  %v546_v34 = vld [vmem:[%s2932_s3 + $0x58] sm:$0xff] }
  0x10   :  { %2153 = vmatprep.subr.mxu0 %v36_v10  ;;  %2187 = vmatprep.subr.mxu1 %v52_v20  ;;  %p2466_p4 = pnand %p2465_p3, %p2459_p0 }
  0x11   :  { %2154 = vmatpush3.msra.mxu0 %v36_v10 }
  0x12   :  { %2156 = vmatmul.mubr.msk.f32.vlgmr.msra.gmra.mxu0 %vm53_vm0, %v2563_v11  ;;  %2207 = vmatprep.subr.mxu0 %v2480_v61 }
  0x13   :  { %2158 = vmatprep.mubr.msk.f32.mxu0 %vm53_vm0, %v2568_v12 }
  0x16   :  { %2159 = vmatmul.mubr.msk.f32.gmra.mxu0 %vm53_vm0, %v2577_v13 }
  0x17   :  { %2161 = vmatprep.mubr.msk.f32.mxu0 %vm53_vm0, %v2582_v14 }
  0x1a   :  { %2162 = vmatmul.mubr.msk.f32.gmra.mxu0 %vm53_vm0, %v2591_v15 }
  0x1b   :  { %2164 = vmatprep.mubr.msk.f32.mxu0 %vm53_vm0, %v2596_v16 }
  0x1e   :  { %2165 = vmatmul.mubr.msk.f32.gmra.mxu0 %vm53_vm0, %v2605_v17 }
  0x1f   :  { %2223 = vmatprep.mubr.msk.f32.mxu0 %vm2481_vm2, %v2480_v61 }
  0xd2   :  { %v2157_v21 = vpop.f32.mrf.mxu0 }
  0xd4   :  { %v144_v22 = vpop.f32.mrf.mxu0 }
  0xd5   :  { %2175 = vmatprep.mubr.msk.f32.mxu1 %vm187_vm1, %v144_v22 }
  0xd6   :  { %v2160_v24 = vpop.f32.mrf.mxu0  ;;  %2176 = vmatmul.mubr.msk.f32.vlgmr.msra.gmra.mxu1 %vm187_vm1, %v2157_v21 }
  0xd7   :  { %2188 = vmatpush3.msra.mxu1 %v52_v20 }
  0xd8   :  { %v154_v25 = vpop.f32.mrf.mxu0  ;;  %2189 = vmatprep.subr.mxu1 %v51_v23 }
  0xd9   :  { %2178 = vmatprep.mubr.msk.f32.mxu1 %vm187_vm1, %v154_v25  ;;  %2190 = vmatpush3.msra.mxu1 %v51_v23 }
  0xda   :  { %v2163_v26 = vpop.f32.mrf.mxu0  ;;  %2179 = vmatmul.mubr.msk.f32.gmra.mxu1 %vm187_vm1, %v2160_v24  ;;  %2191 = vmatprep.subr.mxu1 %v50_v30 }
  0xdb   :  { %2192 = vmatpush3.msra.mxu1 %v50_v30 }
  0xdc   :  { %v164_v27 = vpop.f32.mrf.mxu0  ;;  %2193 = vmatprep.subr.mxu1 %v49_v31 }
  0xdd   :  { %2181 = vmatprep.mubr.msk.f32.mxu1 %vm187_vm1, %v164_v27  ;;  %2194 = vmatpush3.msra.mxu1 %v49_v31 }
  0xde   :  { %v2166_v28 = vpop.f32.mrf.mxu0  ;;  %2182 = vmatmul.mubr.msk.f32.gmra.mxu1 %vm187_vm1, %v2163_v26 }
  0xe0   :  { %v174_v29 = vpop.f32.mrf.mxu0 }
  0xe1   :  { %2184 = vmatprep.mubr.msk.f32.mxu1 %vm187_vm1, %v174_v29 }
  0xe2   :  { %2185 = vmatmul.mubr.msk.f32.gmra.mxu1 %vm187_vm1, %v2166_v28 }
 0x196   :  { %v2177_v37 = vpop.f32.mrf.mxu1 }
 0x197   :  { %v284_v38 = vadd.f32 %v2177_v37, %v186_v36  ;;  %v544_v37 = vld [vmem:[%s2932_s3 + $0x48] sm:$0xff] }
 0x198   :  { %v278_v39 = vpop.f32.mrf.mxu1 }
 0x199   :  { %v279_v40 = vadd.f32 %v278_v39, %v186_v36  ;;  %v318_v43 = vmax.f32 %v284_v38, 0.0  ;;  %v543_v38 = vld [vmem:[%s2932_s3 + $0x40] sm:$0xff]  ;;  %v550_v39 = vld [vmem:[%s2932_s3 + $0x78] sm:$0xff] }
 0x19a   :  { %v2180_v41 = vpop.f32.mrf.mxu1 }
 0x19b   :  { %v317_v42 = vmax.f32 %v279_v40, 0.0  ;;  %v294_v44 = vadd.f32 %v2180_v41, %v186_v36 }
 0x19c   :  { %v288_v45 = vpop.f32.mrf.mxu1 }
 0x19d   :  { %v289_v46 = vadd.f32 %v288_v45, %v186_v36  ;;  %2195 = vmatprep.mubr.msk.f32.mxu1 %vm187_vm1, %v317_v42  ;;  %v320_v49 = vmax.f32 %v294_v44, 0.0  ;;  %v549_v44 = vld [vmem:[%s2932_s3 + $0x70] sm:$0xff] }
 0x19e   :  { %v2183_v47 = vpop.f32.mrf.mxu1  ;;  %2196 = vmatmul.mubr.msk.f32.vlgmr.msra.gmra.mxu1 %vm187_vm1, %v318_v43 }
 0x19f   :  { %v319_v48 = vmax.f32 %v289_v46, 0.0  ;;  %v304_v50 = vadd.f32 %v2183_v47, %v186_v36 }
 0x1a0   :  { %v298_v51 = vpop.f32.mrf.mxu1 }
 0x1a1   :  { %v299_v52 = vadd.f32 %v298_v51, %v186_v36  ;;  %2198 = vmatprep.mubr.msk.f32.mxu1 %vm187_vm1, %v319_v48  ;;  %v322_v55 = vmax.f32 %v304_v50, 0.0  ;;  %v548_v51 = vld [vmem:[%s2932_s3 + $0x68] sm:$0xff] }
 0x1a2   :  { %v2186_v53 = vpop.f32.mrf.mxu1  ;;  %2199 = vmatmul.mubr.msk.f32.gmra.mxu1 %vm187_vm1, %v320_v49 }
 0x1a3   :  { %v321_v54 = vmax.f32 %v299_v52, 0.0  ;;  %v314_v56 = vadd.f32 %v2186_v53, %v186_v36  ;;  %v547_v52 = vld [vmem:[%s2932_s3 + $0x60] sm:$0xff]  ;;  %v658_v53 = vsub.s32 2, %v2635_v33 }
 0x1a4   :  { %v308_v57 = vpop.f32.mrf.mxu1 }
 0x1a5   :  { %v309_v58 = vadd.f32 %v308_v57, %v186_v36  ;;  %2201 = vmatprep.mubr.msk.f32.mxu1 %vm187_vm1, %v321_v54  ;;  %v324_v60 = vmax.f32 %v314_v56, 0.0  ;;  %v545_v36 = vld [vmem:[%s2932_s3 + $0x50] sm:$0xff]  ;;  %v659_v54 = vrot.slane %v2641_v35, %v658_v53 }
 0x1a6   :  { %2202 = vmatmul.mubr.msk.f32.gmra.mxu1 %vm187_vm1, %v322_v55 }
 0x1a7   :  { %v323_v59 = vmax.f32 %v309_v58, 0.0 }
 0x1a9   :  { %2204 = vmatprep.mubr.msk.f32.mxu1 %vm187_vm1, %v323_v59 }
 0x1aa   :  { %2205 = vmatmul.mubr.msk.f32.gmra.mxu1 %vm187_vm1, %v324_v60 }
 0x1ab   :  { %2242 = vmatprep.mubr.msk.f32.mxu1 %vm53_vm0, %v2535_v3 }
 0x25e   :  { %v2197_v62 = vpop.f32.mrf.mxu1 }
 0x25f   :  { %v425_v26 = vadd.f32 %v2197_v62, %v328_v6 }
 0x260   :  { %v419_v63 = vpop.f32.mrf.mxu1 }
 0x261   :  { %v420_v28 = vadd.f32 %v419_v63, %v328_v6  ;;  %v459_v30 = vmax.f32 %v425_v26, 0.0 }
 0x262   :  { %v2200_v0 = vpop.f32.mrf.mxu1 }
 0x263   :  { %v435_v22 = vadd.f32 %v2200_v0, %v328_v6  ;;  %v458_v31 = vmax.f32 %v420_v28, 0.0 }
 0x264   :  { %v429_v1 = vpop.f32.mrf.mxu1 }
 0x265   :  { %v430_v24 = vadd.f32 %v429_v1, %v328_v6  ;;  %v461_v27 = vmax.f32 %v435_v22, 0.0  ;;  %v542_v1 = vld [vmem:[%s2934_s5 + $0x18] sm:$0xff] }
 0x266   :  { %v2203_v4 = vpop.f32.mrf.mxu1 }
 0x267   :  { %v445_v10 = vadd.f32 %v2203_v4, %v328_v6  ;;  %v460_v29 = vmax.f32 %v430_v24, 0.0 }
 0x268   :  { %v439_v5 = vpop.f32.mrf.mxu1 }
 0x269   :  { %v440_v20 = vadd.f32 %v439_v5, %v328_v6  ;;  %v463_v23 = vmax.f32 %v445_v10, 0.0  ;;  %v541_v5 = vld [vmem:[%s2934_s5 + $0x10] sm:$0xff]  ;;  %v540_v10 = vld [vmem:[%s2934_s5 + $0x8] sm:$0xff] }
 0x26a   :  { %v2206_v7 = vpop.f32.mrf.mxu1 }
 0x26b   :  { %v455_v8 = vadd.f32 %v2206_v7, %v328_v6  ;;  %v462_v25 = vmax.f32 %v440_v20, 0.0  ;;  %v539_v20 = vld [vmem:[%s2934_s5] sm:$0xff] }
 0x26c   :  { %v449_v9 = vpop.f32.mrf.mxu1 }
 0x26d   :  { %v465_v18 = vmax.f32 %v455_v8, 0.0  ;;  %v450_v19 = vadd.f32 %v449_v9, %v328_v6 }
 0x26f   :  { %v464_v21 = vmax.f32 %v450_v19, 0.0  ;;  %2208 = vmatpush3.msra.mxu0 %v465_v18  ;;  %2226 = vmatprep.subr.mxu1 %v465_v18 }
 0x270   :  { %2209 = vmatprep.subr.mxu0 %v2480_v61  ;;  %2227 = vmatpush3.msra.mxu1 %v465_v18 }
 0x271   :  { %2210 = vmatpush3.msra.mxu0 %v464_v21  ;;  %2228 = vmatprep.subr.mxu1 %v464_v21 }
 0x272   :  { %2211 = vmatprep.subr.mxu0 %v2480_v61  ;;  %2229 = vmatpush3.msra.mxu1 %v464_v21 }
 0x273   :  { %2212 = vmatpush3.msra.mxu0 %v463_v23  ;;  %2230 = vmatprep.subr.mxu1 %v463_v23 }
 0x274   :  { %2213 = vmatprep.subr.mxu0 %v2480_v61  ;;  %2231 = vmatpush3.msra.mxu1 %v463_v23 }
 0x275   :  { %2214 = vmatpush3.msra.mxu0 %v462_v25  ;;  %2232 = vmatprep.subr.mxu1 %v462_v25 }
 0x276   :  { %2215 = vmatprep.subr.mxu0 %v2480_v61  ;;  %2233 = vmatpush3.msra.mxu1 %v462_v25 }
 0x277   :  { %2216 = vmatpush3.msra.mxu0 %v461_v27  ;;  %2234 = vmatprep.subr.mxu1 %v461_v27 }
 0x278   :  { %2217 = vmatprep.subr.mxu0 %v2480_v61  ;;  %2235 = vmatpush3.msra.mxu1 %v461_v27 }
 0x279   :  { %2218 = vmatpush3.msra.mxu0 %v460_v29  ;;  %2236 = vmatprep.subr.mxu1 %v460_v29 }
 0x27a   :  { %2219 = vmatprep.subr.mxu0 %v2480_v61  ;;  %2237 = vmatpush3.msra.mxu1 %v460_v29 }
 0x27b   :  { %2220 = vmatpush3.msra.mxu0 %v459_v30  ;;  %2238 = vmatprep.subr.mxu1 %v459_v30 }
 0x27c   :  { %2221 = vmatprep.subr.mxu0 %v2480_v61  ;;  %2239 = vmatpush3.msra.mxu1 %v459_v30 }
 0x27d   :  { %2222 = vmatpush3.msra.mxu0 %v458_v31  ;;  %2240 = vmatprep.subr.mxu1 %v458_v31 }
 0x27e   :  { %2241 = vmatpush3.msra.mxu1 %v458_v31  ;;  %2224 = vmatmul.mubr.msk.f32.vlgmr.msra.gmra.mxu0 %vm53_vm0, %v2668_v32 }
 0x27f   :  { %2243 = vmatmul.mubr.msk.f32.vlgmr.msra.gmra.mxu1 %vm53_vm0, %v2563_v11  ;;  %2254 = vmatprep.subr.mxu0 %v546_v34 }
 0x280   :  { %2245 = vmatprep.mubr.msk.f32.mxu1 %vm53_vm0, %v2568_v12  ;;  %2255 = vmatpush3.msra.mxu0 %v546_v34  ;;  %v799_v34 = vsub.s32 3, %v2635_v33 }
 0x281   :  { %2256 = vmatprep.subr.mxu0 %v545_v36  ;;  %2294 = vmatprep.subr.mxu1 %v2480_v61 }
 0x282   :  { %2257 = vmatpush3.msra.mxu0 %v545_v36 }
 0x283   :  { %2246 = vmatmul.mubr.msk.f32.gmra.mxu1 %vm53_vm0, %v2577_v13  ;;  %2258 = vmatprep.subr.mxu0 %v544_v37 }
 0x284   :  { %2248 = vmatprep.mubr.msk.f32.mxu1 %vm53_vm0, %v2582_v14  ;;  %2259 = vmatpush3.msra.mxu0 %v544_v37 }
 0x285   :  { %2260 = vmatprep.subr.mxu0 %v543_v38 }
 0x286   :  { %2261 = vmatpush3.msra.mxu0 %v543_v38  ;;  %v800_v38 = vrot.slane %v2641_v35, %v799_v34 }
 0x287   :  { %2249 = vmatmul.mubr.msk.f32.gmra.mxu1 %vm53_vm0, %v2591_v15  ;;  %2274 = vmatprep.subr.mxu0 %v550_v39 }
 0x288   :  { %2251 = vmatprep.mubr.msk.f32.mxu1 %vm53_vm0, %v2596_v16 }
 0x28b   :  { %2252 = vmatmul.mubr.msk.f32.gmra.mxu1 %vm53_vm0, %v2605_v17 }
 0x28c   :  { %2310 = vmatprep.mubr.msk.f32.mxu1 %vm2481_vm2, %v2480_v61 }
 0x33e   :  { %v2705_v40 = vpop.f32.mrf.mxu0 }
 0x33f   :  { %v2244_v41 = vpop.f32.mrf.mxu1 }
 0x340   :  { %v2225_v42 = vpop.f32.mrf.mxu0 }
 0x341   :  { %v617_v43 = vpop.f32.mrf.mxu1 }
 0x342   :  { %2262 = vmatprep.mubr.msk.f32.mxu0 %vm187_vm1, %v617_v43 }
 0x343   :  { %v2247_v45 = vpop.f32.mrf.mxu1  ;;  %2263 = vmatmul.mubr.msk.f32.vlgmr.msra.gmra.mxu0 %vm187_vm1, %v2244_v41 }
 0x344   :  { %2275 = vmatpush3.msra.mxu0 %v550_v39 }
 0x345   :  { %v627_v46 = vpop.f32.mrf.mxu1  ;;  %2276 = vmatprep.subr.mxu0 %v549_v44 }
 0x346   :  { %2265 = vmatprep.mubr.msk.f32.mxu0 %vm187_vm1, %v627_v46  ;;  %2277 = vmatpush3.msra.mxu0 %v549_v44 }
 0x347   :  { %v2250_v47 = vpop.f32.mrf.mxu1  ;;  %2266 = vmatmul.mubr.msk.f32.gmra.mxu0 %vm187_vm1, %v2247_v45  ;;  %2278 = vmatprep.subr.mxu0 %v548_v51 }
 0x348   :  { %2279 = vmatpush3.msra.mxu0 %v548_v51 }
 0x349   :  { %v637_v48 = vpop.f32.mrf.mxu1  ;;  %2280 = vmatprep.subr.mxu0 %v547_v52 }
 0x34a   :  { %2268 = vmatprep.mubr.msk.f32.mxu0 %vm187_vm1, %v637_v48  ;;  %2281 = vmatpush3.msra.mxu0 %v547_v52 }
 0x34b   :  { %v2253_v49 = vpop.f32.mrf.mxu1  ;;  %2269 = vmatmul.mubr.msk.f32.gmra.mxu0 %vm187_vm1, %v2250_v47  ;;  %2324 = vmatprep.subr.mxu0 %v2480_v61 }
 0x34d   :  { %v647_v50 = vpop.f32.mrf.mxu1 }
 0x34e   :  { %2271 = vmatprep.mubr.msk.f32.mxu0 %vm187_vm1, %v647_v50 }
 0x34f   :  { %2272 = vmatmul.mubr.msk.f32.gmra.mxu0 %vm187_vm1, %v2253_v49 }
 0x403   :  { %v2264_v55 = vpop.f32.mrf.mxu0 }
 0x404   :  { %v756_v56 = vadd.f32 %v2264_v55, %v659_v54 }
 0x405   :  { %v750_v57 = vpop.f32.mrf.mxu0 }
 0x406   :  { %v751_v58 = vadd.f32 %v750_v57, %v659_v54  ;;  %v790_v62 = vmax.f32 %v756_v56, 0.0 }
 0x407   :  { %v2267_v59 = vpop.f32.mrf.mxu0 }
 0x408   :  { %v789_v60 = vmax.f32 %v751_v58, 0.0  ;;  %v766_v63 = vadd.f32 %v2267_v59, %v659_v54  ;;  %v1011_v59 = vld [vmem:[%s2934_s5 + $0x38] sm:$0xff] }
 0x409   :  { %v760_v0 = vpop.f32.mrf.mxu0 }
 0x40a   :  { %v761_v2 = vadd.f32 %v760_v0, %v659_v54  ;;  %2282 = vmatprep.mubr.msk.f32.mxu0 %vm187_vm1, %v789_v60  ;;  %v792_v7 = vmax.f32 %v766_v63, 0.0  ;;  %v1010_v60 = vld [vmem:[%s2934_s5 + $0x30] sm:$0xff]  ;;  %v1008_v63 = vld [vmem:[%s2934_s5 + $0x20] sm:$0xff] }
 0x40b   :  { %v2270_v4 = vpop.f32.mrf.mxu0  ;;  %2283 = vmatmul.mubr.msk.f32.vlgmr.msra.gmra.mxu0 %vm187_vm1, %v790_v62  ;;  %v1009_v62 = vld [vmem:[%s2934_s5 + $0x28] sm:$0xff] }
 0x40c   :  { %v791_v6 = vmax.f32 %v761_v2, 0.0  ;;  %2325 = vmatpush3.msra.mxu0 %v542_v1  ;;  %v776_v8 = vadd.f32 %v2270_v4, %v659_v54  ;;  %v1164_v4 = vld [vmem:[%s2932_s3 + $0xb0] sm:$0xff] }
 0x40d   :  { %v770_v9 = vpop.f32.mrf.mxu0  ;;  %2326 = vmatprep.subr.mxu0 %v2480_v61 }
 0x40e   :  { %v771_v18 = vadd.f32 %v770_v9, %v659_v54  ;;  %2285 = vmatprep.mubr.msk.f32.mxu0 %vm187_vm1, %v791_v6  ;;  %2327 = vmatpush3.msra.mxu0 %v541_v5  ;;  %v794_v22 = vmax.f32 %v776_v8, 0.0 }
 0x40f   :  { %v2273_v19 = vpop.f32.mrf.mxu0  ;;  %2286 = vmatmul.mubr.msk.f32.gmra.mxu0 %vm187_vm1, %v792_v7  ;;  %2328 = vmatprep.subr.mxu0 %v2480_v61 }
 0x410   :  { %v793_v21 = vmax.f32 %v771_v18, 0.0  ;;  %2329 = vmatpush3.msra.mxu0 %v540_v10  ;;  %v786_v23 = vadd.f32 %v2273_v19, %v659_v54  ;;  %v1163_v18 = vld [vmem:[%s2932_s3 + $0xa8] sm:$0xff]  ;;  %v1162_v19 = vld [vmem:[%s2932_s3 + $0xa0] sm:$0xff] }
 0x411   :  { %v780_v24 = vpop.f32.mrf.mxu0  ;;  %2330 = vmatprep.subr.mxu0 %v2480_v61 }
 0x412   :  { %v781_v25 = vadd.f32 %v780_v24, %v659_v54  ;;  %2288 = vmatprep.mubr.msk.f32.mxu0 %vm187_vm1, %v793_v21  ;;  %2331 = vmatpush3.msra.mxu0 %v539_v20  ;;  %v796_v27 = vmax.f32 %v786_v23, 0.0  ;;  %v1273_v20 = vsub.s32 4, %v2635_v33 }
 0x413   :  { %2289 = vmatmul.mubr.msk.f32.gmra.mxu0 %vm187_vm1, %v794_v22 }
 0x414   :  { %v795_v26 = vmax.f32 %v781_v25, 0.0  ;;  %v1274_v21 = vrot.slane %v2641_v35, %v1273_v20 }
 0x416   :  { %2291 = vmatprep.mubr.msk.f32.mxu0 %vm187_vm1, %v795_v26 }
 0x417   :  { %2292 = vmatmul.mubr.msk.f32.gmra.mxu0 %vm187_vm1, %v796_v27 }
 0x418   :  { %2332 = vmatprep.mubr.msk.f32.mxu0 %vm2481_vm2, %v2480_v61 }
 0x41b   :  { %2333 = vmatmul.mubr.msk.f32.vlgmr.msra.gmra.mxu0 %vm187_vm1, %v2705_v40 }
 0x4cb   :  { %v2284_v28 = vpop.f32.mrf.mxu0 }
 0x4cc   :  { %v897_v53 = vadd.f32 %v2284_v28, %v800_v38 }
 0x4cd   :  { %v891_v29 = vpop.f32.mrf.mxu0 }
 0x4ce   :  { %v892_v55 = vadd.f32 %v891_v29, %v800_v38  ;;  %v931_v57 = vmax.f32 %v897_v53, 0.0 }
 0x4cf   :  { %v2287_v30 = vpop.f32.mrf.mxu0 }
 0x4d0   :  { %v907_v49 = vadd.f32 %v2287_v30, %v800_v38  ;;  %v930_v58 = vmax.f32 %v892_v55, 0.0 }
 0x4d1   :  { %v901_v31 = vpop.f32.mrf.mxu0 }
 0x4d2   :  { %v902_v51 = vadd.f32 %v901_v31, %v800_v38  ;;  %v933_v54 = vmax.f32 %v907_v49, 0.0 }
 0x4d3   :  { %v2290_v36 = vpop.f32.mrf.mxu0 }
 0x4d4   :  { %v917_v43 = vadd.f32 %v2290_v36, %v800_v38  ;;  %v932_v56 = vmax.f32 %v902_v51, 0.0 }
 0x4d5   :  { %v911_v37 = vpop.f32.mrf.mxu0 }
 0x4d6   :  { %v912_v47 = vadd.f32 %v911_v37, %v800_v38  ;;  %v935_v50 = vmax.f32 %v917_v43, 0.0 }
 0x4d7   :  { %v2293_v39 = vpop.f32.mrf.mxu0 }
 0x4d8   :  { %v927_v41 = vadd.f32 %v2293_v39, %v800_v38  ;;  %v934_v52 = vmax.f32 %v912_v47, 0.0 }
 0x4d9   :  { %v921_v42 = vpop.f32.mrf.mxu0 }
 0x4da   :  { %v937_v44 = vmax.f32 %v927_v41, 0.0  ;;  %v922_v45 = vadd.f32 %v921_v42, %v800_v38 }
 0x4db   :  { %v2756_v46 = vpop.f32.mrf.mxu0 }
 0x4dc   :  { %v936_v40 = vmax.f32 %v922_v45, 0.0  ;;  %2295 = vmatpush3.msra.mxu1 %v937_v44 }
 0x4dd   :  { %2296 = vmatprep.subr.mxu1 %v2480_v61  ;;  %v2334_v48 = vpop.f32.mrf.mxu0 }
 0x4de   :  { %2297 = vmatpush3.msra.mxu1 %v936_v40 }
 0x4df   :  { %2298 = vmatprep.subr.mxu1 %v2480_v61 }
 0x4e0   :  { %2299 = vmatpush3.msra.mxu1 %v935_v50 }
 0x4e1   :  { %2300 = vmatprep.subr.mxu1 %v2480_v61 }
 0x4e2   :  { %2301 = vmatpush3.msra.mxu1 %v934_v52 }
 0x4e3   :  { %2302 = vmatprep.subr.mxu1 %v2480_v61 }
 0x4e4   :  { %2303 = vmatpush3.msra.mxu1 %v933_v54 }
 0x4e5   :  { %2304 = vmatprep.subr.mxu1 %v2480_v61 }
 0x4e6   :  { %2305 = vmatpush3.msra.mxu1 %v932_v56 }
 0x4e7   :  { %2306 = vmatprep.subr.mxu1 %v2480_v61 }
 0x4e8   :  { %2307 = vmatpush3.msra.mxu1 %v931_v57 }
 0x4e9   :  { %2308 = vmatprep.subr.mxu1 %v2480_v61 }
 0x4ea   :  { %2309 = vmatpush3.msra.mxu1 %v930_v58 }
 0x4eb   :  { %2311 = vmatmul.mubr.msk.f32.vlgmr.msra.gmra.mxu1 %vm53_vm0, %v2668_v32  ;;  %2313 = vmatprep.subr.mxu1 %v2480_v61 }
 0x4ec   :  { %2314 = vmatpush3.msra.mxu1 %v1011_v59  ;;  %2321 = vmatprep.mubr.msk.f32.mxu1 %vm2481_vm2, %v2480_v61 }
 0x4ed   :  { %2315 = vmatprep.subr.mxu1 %v2480_v61 }
 0x4ee   :  { %2316 = vmatpush3.msra.mxu1 %v1010_v60 }
 0x4ef   :  { %2317 = vmatprep.subr.mxu1 %v2480_v61 }
 0x4f0   :  { %2318 = vmatpush3.msra.mxu1 %v1009_v62 }
 0x4f1   :  { %2319 = vmatprep.subr.mxu1 %v2480_v61 }
 0x4f2   :  { %2320 = vmatpush3.msra.mxu1 %v1008_v63 }
 0x4f3   :  { %2335 = vmatprep.subr.mxu1 %v937_v44 }
 0x5ab   :  { %v1004_v0 = vpop.f32.mrf.mxu1 }
 0x5ac   :  { %2322 = vmatmul.mubr.msk.f32.vlgmr.msra.gmra.mxu1 %vm187_vm1, %v1004_v0 }
 0x5ad   :  { %2336 = vmatpush3.msra.mxu1 %v937_v44  ;;  %v2312_v1 = vpop.f32.mrf.mxu1  ;;  %2351 = vmatprep.mubr.msk.f32.mxu1 %vm53_vm0, %v2535_v3  ;;  %v1161_v3 = vld [vmem:[%s2932_s3 + $0x98] sm:$0xff] }
 0x5ae   :  { %2337 = vmatprep.subr.mxu1 %v936_v40  ;;  %2363 = vmatprep.subr.mxu0 %v1161_v3 }
 0x5af   :  { %2338 = vmatpush3.msra.mxu1 %v936_v40  ;;  %2364 = vmatpush3.msra.mxu0 %v1161_v3 }
 0x5b0   :  { %2339 = vmatprep.subr.mxu1 %v935_v50 }
 0x5b1   :  { %2340 = vmatpush3.msra.mxu1 %v935_v50 }
 0x5b2   :  { %2341 = vmatprep.subr.mxu1 %v934_v52 }
 0x5b3   :  { %2342 = vmatpush3.msra.mxu1 %v934_v52 }
 0x5b4   :  { %2343 = vmatprep.subr.mxu1 %v933_v54 }
 0x5b5   :  { %2344 = vmatpush3.msra.mxu1 %v933_v54  ;;  %v1414_v54 = vsub.s32 5, %v2635_v33 }
 0x5b6   :  { %2345 = vmatprep.subr.mxu1 %v932_v56 }
 0x5b7   :  { %2346 = vmatpush3.msra.mxu1 %v932_v56 }
 0x5b8   :  { %2347 = vmatprep.subr.mxu1 %v931_v57 }
 0x5b9   :  { %2348 = vmatpush3.msra.mxu1 %v931_v57  ;;  %v1415_v57 = vrot.slane %v2641_v35, %v1414_v54 }
 0x5ba   :  { %2349 = vmatprep.subr.mxu1 %v930_v58 }
 0x5bb   :  { %2350 = vmatpush3.msra.mxu1 %v930_v58 }
 0x5bc   :  { %2352 = vmatmul.mubr.msk.f32.vlgmr.msra.gmra.mxu1 %vm53_vm0, %v2563_v11  ;;  %2403 = vmatprep.subr.mxu1 %v2480_v61  ;;  %v1160_v11 = vld [vmem:[%s2932_s3 + $0x90] sm:$0xff] }
 0x5bd   :  { %2354 = vmatprep.mubr.msk.f32.mxu1 %vm53_vm0, %v2568_v12  ;;  %2365 = vmatprep.subr.mxu0 %v1160_v11  ;;  %v1159_v12 = vld [vmem:[%s2932_s3 + $0x88] sm:$0xff] }
 0x5be   :  { %2366 = vmatpush3.msra.mxu0 %v1160_v11 }
 0x5bf   :  { %2367 = vmatprep.subr.mxu0 %v1159_v12 }
 0x5c0   :  { %2355 = vmatmul.mubr.msk.f32.gmra.mxu1 %vm53_vm0, %v2577_v13  ;;  %2368 = vmatpush3.msra.mxu0 %v1159_v12  ;;  %v1158_v13 = vld [vmem:[%s2932_s3 + $0x80] sm:$0xff] }
 0x5c1   :  { %2357 = vmatprep.mubr.msk.f32.mxu1 %vm53_vm0, %v2582_v14  ;;  %2369 = vmatprep.subr.mxu0 %v1158_v13  ;;  %v1165_v14 = vld [vmem:[%s2932_s3 + $0xb8] sm:$0xff] }
 0x5c2   :  { %2370 = vmatpush3.msra.mxu0 %v1158_v13 }
 0x5c3   :  { %2383 = vmatprep.subr.mxu0 %v1165_v14 }
 0x5c4   :  { %2358 = vmatmul.mubr.msk.f32.gmra.mxu1 %vm53_vm0, %v2591_v15 }
 0x5c5   :  { %2360 = vmatprep.mubr.msk.f32.mxu1 %vm53_vm0, %v2596_v16 }
 0x5c8   :  { %2361 = vmatmul.mubr.msk.f32.gmra.mxu1 %vm53_vm0, %v2605_v17 }
 0x5c9   :  { %2419 = vmatprep.mubr.msk.f32.mxu1 %vm2481_vm2, %v2480_v61 }
 0x66c   :  { %v2820_v15 = vpop.f32.mrf.mxu1 }
 0x66e   :  { %v2323_v16 = vpop.f32.mrf.mxu1 }
 0x67c   :  { %v2353_v17 = vpop.f32.mrf.mxu1 }
 0x67e   :  { %v1232_v2 = vpop.f32.mrf.mxu1 }
 0x67f   :  { %2371 = vmatprep.mubr.msk.f32.mxu0 %vm187_vm1, %v1232_v2 }
 0x680   :  { %v2356_v5 = vpop.f32.mrf.mxu1  ;;  %2372 = vmatmul.mubr.msk.f32.vlgmr.msra.gmra.mxu0 %vm187_vm1, %v2353_v17 }
 0x681   :  { %2384 = vmatpush3.msra.mxu0 %v1165_v14 }
 0x682   :  { %v1242_v6 = vpop.f32.mrf.mxu1  ;;  %2385 = vmatprep.subr.mxu0 %v1164_v4 }
 0x683   :  { %2374 = vmatprep.mubr.msk.f32.mxu0 %vm187_vm1, %v1242_v6  ;;  %2386 = vmatpush3.msra.mxu0 %v1164_v4 }
 0x684   :  { %v2359_v7 = vpop.f32.mrf.mxu1  ;;  %2375 = vmatmul.mubr.msk.f32.gmra.mxu0 %vm187_vm1, %v2356_v5  ;;  %2387 = vmatprep.subr.mxu0 %v1163_v18 }
 0x685   :  { %2388 = vmatpush3.msra.mxu0 %v1163_v18  ;;  %v1709_v18 = vld [vmem:[%s2934_s5 + $0x70] sm:$0xff] }
 0x686   :  { %v1252_v8 = vpop.f32.mrf.mxu1  ;;  %2389 = vmatprep.subr.mxu0 %v1162_v19 }
 0x687   :  { %2377 = vmatprep.mubr.msk.f32.mxu0 %vm187_vm1, %v1252_v8  ;;  %2390 = vmatpush3.msra.mxu0 %v1162_v19  ;;  %v1625_v8 = vld [vmem:[%s2934_s5 + $0x50] sm:$0xff] }
 0x688   :  { %v2362_v9 = vpop.f32.mrf.mxu1  ;;  %2378 = vmatmul.mubr.msk.f32.gmra.mxu0 %vm187_vm1, %v2359_v7  ;;  %2433 = vmatprep.subr.mxu0 %v2480_v61  ;;  %v1626_v7 = vld [vmem:[%s2934_s5 + $0x58] sm:$0xff] }
 0x68a   :  { %v1262_v10 = vpop.f32.mrf.mxu1 }
 0x68b   :  { %2380 = vmatprep.mubr.msk.f32.mxu0 %vm187_vm1, %v1262_v10  ;;  %v1710_v10 = vld [vmem:[%s2934_s5 + $0x78] sm:$0xff] }
 0x68c   :  { %2381 = vmatmul.mubr.msk.f32.gmra.mxu0 %vm187_vm1, %v2362_v9  ;;  %v1624_v9 = vld [vmem:[%s2934_s5 + $0x48] sm:$0xff] }
 0x740   :  { %v2373_v22 = vpop.f32.mrf.mxu0 }
 0x741   :  { %v1371_v23 = vadd.f32 %v2373_v22, %v1274_v21  ;;  %v1707_v22 = vld [vmem:[%s2934_s5 + $0x60] sm:$0xff] }
 0x742   :  { %v1365_v24 = vpop.f32.mrf.mxu0 }
 0x743   :  { %v1366_v25 = vadd.f32 %v1365_v24, %v1274_v21  ;;  %v1405_v28 = vmax.f32 %v1371_v23, 0.0  ;;  %v1792_v23 = vld [vmem:[%s2935_s6 + $0x18] sm:$0xff]  ;;  %v1703_v24 = vsub.s32 6, %v2635_v33 }
 0x744   :  { %v2376_v26 = vpop.f32.mrf.mxu0 }
 0x745   :  { %v1404_v27 = vmax.f32 %v1366_v25, 0.0  ;;  %v1381_v29 = vadd.f32 %v2376_v26, %v1274_v21  ;;  %v1155_v25 = vadd.f32 %v2756_v46, %v2820_v15  ;;  %v1704_v26 = vrot.slane %v2641_v35, %v1703_v24  ;;  %v1790_v46 = vld [vmem:[%s2935_s6 + $0x8] sm:$0xff]  ;;  %v1789_v15 = vld [vmem:[%s2935_s6] sm:$0xff] }
 0x746   :  { %v1375_v30 = vpop.f32.mrf.mxu0 }
 0x747   :  { %v1376_v31 = vadd.f32 %v1375_v30, %v1274_v21  ;;  %2391 = vmatprep.mubr.msk.f32.mxu0 %vm187_vm1, %v1404_v27  ;;  %v1407_v37 = vmax.f32 %v1381_v29, 0.0 }
 0x748   :  { %v2379_v34 = vpop.f32.mrf.mxu0  ;;  %2392 = vmatmul.mubr.msk.f32.vlgmr.msra.gmra.mxu0 %vm187_vm1, %v1405_v28 }
 0x749   :  { %v1406_v36 = vmax.f32 %v1376_v31, 0.0  ;;  %v1391_v38 = vadd.f32 %v2379_v34, %v1274_v21  ;;  %2434 = vmatpush3.msra.mxu0 %v1710_v10  ;;  %v1791_v34 = vld [vmem:[%s2935_s6 + $0x10] sm:$0xff] }
 0x74a   :  { %v1385_v39 = vpop.f32.mrf.mxu0  ;;  %2435 = vmatprep.subr.mxu0 %v2480_v61 }
 0x74b   :  { %v1386_v41 = vadd.f32 %v1385_v39, %v1274_v21  ;;  %2394 = vmatprep.mubr.msk.f32.mxu0 %vm187_vm1, %v1406_v36  ;;  %v1409_v44 = vmax.f32 %v1391_v38, 0.0  ;;  %2436 = vmatpush3.msra.mxu0 %v1709_v18  ;;  %v1713_v36 = vsub.s32 7, %v2635_v33 }
 0x74c   :  { %v2382_v42 = vpop.f32.mrf.mxu0  ;;  %2395 = vmatmul.mubr.msk.f32.gmra.mxu0 %vm187_vm1, %v1407_v37  ;;  %2437 = vmatprep.subr.mxu0 %v2480_v61 }
 0x74d   :  { %v1408_v43 = vmax.f32 %v1386_v41, 0.0  ;;  %v1401_v45 = vadd.f32 %v2382_v42, %v1274_v21  ;;  %v1714_v37 = vrot.slane %v2641_v35, %v1713_v36 }
 0x74e   :  { %v1395_v47 = vpop.f32.mrf.mxu0 }
 0x74f   :  { %v1396_v40 = vadd.f32 %v1395_v47, %v1274_v21  ;;  %2397 = vmatprep.mubr.msk.f32.mxu0 %vm187_vm1, %v1408_v43  ;;  %v1411_v49 = vmax.f32 %v1401_v45, 0.0  ;;  %v1708_v21 = vld [vmem:[%s2934_s5 + $0x68] sm:$0xff]  ;;  %v1965_v43 = vld [vmem:[%s2935_s6 + $0x20] ss:$0 sm:$0xff] }
 0x750   :  { %2398 = vmatmul.mubr.msk.f32.gmra.mxu0 %vm187_vm1, %v1409_v44 }
 0x751   :  { %v1410_v48 = vmax.f32 %v1396_v40, 0.0  ;;  %2438 = vmatpush3.msra.mxu0 %v1708_v21 }
 0x752   :  { %2439 = vmatprep.subr.mxu0 %v2480_v61 }
 0x753   :  { %2400 = vmatprep.mubr.msk.f32.mxu0 %vm187_vm1, %v1410_v48  ;;  %2440 = vmatpush3.msra.mxu0 %v1707_v22 }
 0x754   :  { %2401 = vmatmul.mubr.msk.f32.gmra.mxu0 %vm187_vm1, %v1411_v49 }
 0x755   :  { %2441 = vmatprep.mubr.msk.f32.mxu0 %vm2481_vm2, %v2480_v61 }
 0x808   :  { %v2393_v50 = vpop.f32.mrf.mxu0 }
 0x809   :  { %v1512_v16 = vadd.f32 %v2393_v50, %v1415_v57 }
 0x80a   :  { %v1506_v51 = vpop.f32.mrf.mxu0 }
 0x80b   :  { %v1507_v2 = vadd.f32 %v1506_v51, %v1415_v57  ;;  %v1546_v5 = vmax.f32 %v1512_v16, 0.0 }
 0x80c   :  { %v2396_v52 = vpop.f32.mrf.mxu0 }
 0x80d   :  { %v1522_v11 = vadd.f32 %v2396_v52, %v1415_v57  ;;  %v1545_v6 = vmax.f32 %v1507_v2, 0.0 }
 0x80e   :  { %v1516_v53 = vpop.f32.mrf.mxu0 }
 0x80f   :  { %v1517_v13 = vadd.f32 %v1516_v53, %v1415_v57  ;;  %v1548_v17 = vmax.f32 %v1522_v11, 0.0 }
 0x810   :  { %v2399_v55 = vpop.f32.mrf.mxu0 }
 0x811   :  { %v1532_v62 = vadd.f32 %v2399_v55, %v1415_v57  ;;  %v1547_v4 = vmax.f32 %v1517_v13, 0.0 }
 0x812   :  { %v1526_v56 = vpop.f32.mrf.mxu0 }
 0x813   :  { %v1527_v1 = vadd.f32 %v1526_v56, %v1415_v57  ;;  %v1550_v12 = vmax.f32 %v1532_v62, 0.0 }
 0x814   :  { %v2402_v58 = vpop.f32.mrf.mxu0 }
 0x815   :  { %v1542_v59 = vadd.f32 %v2402_v58, %v1415_v57  ;;  %v1549_v14 = vmax.f32 %v1527_v1, 0.0 }
 0x816   :  { %v1536_v60 = vpop.f32.mrf.mxu0 }
 0x817   :  { %v1552_v63 = vmax.f32 %v1542_v59, 0.0  ;;  %v1537_v0 = vadd.f32 %v1536_v60, %v1415_v57 }
 0x819   :  { %v1551_v3 = vmax.f32 %v1537_v0, 0.0  ;;  %2404 = vmatpush3.msra.mxu1 %v1552_v63 }
 0x81a   :  { %2405 = vmatprep.subr.mxu1 %v2480_v61 }
 0x81b   :  { %2406 = vmatpush3.msra.mxu1 %v1551_v3 }
 0x81c   :  { %2407 = vmatprep.subr.mxu1 %v2480_v61 }
 0x81d   :  { %2408 = vmatpush3.msra.mxu1 %v1550_v12 }
 0x81e   :  { %2409 = vmatprep.subr.mxu1 %v2480_v61 }
 0x81f   :  { %2410 = vmatpush3.msra.mxu1 %v1549_v14 }
 0x820   :  { %2411 = vmatprep.subr.mxu1 %v2480_v61 }
 0x821   :  { %2412 = vmatpush3.msra.mxu1 %v1548_v17 }
 0x822   :  { %2413 = vmatprep.subr.mxu1 %v2480_v61 }
 0x823   :  { %2414 = vmatpush3.msra.mxu1 %v1547_v4 }
 0x824   :  { %2415 = vmatprep.subr.mxu1 %v2480_v61 }
 0x825   :  { %2416 = vmatpush3.msra.mxu1 %v1546_v5 }
 0x826   :  { %2417 = vmatprep.subr.mxu1 %v2480_v61 }
 0x827   :  { %2418 = vmatpush3.msra.mxu1 %v1545_v6 }
 0x828   :  { %2420 = vmatmul.mubr.msk.f32.vlgmr.msra.gmra.mxu1 %vm53_vm0, %v2668_v32  ;;  %2422 = vmatprep.subr.mxu1 %v2480_v61  ;;  %v1623_v32 = vld [vmem:[%s2934_s5 + $0x40] sm:$0xff] }
 0x829   :  { %2423 = vmatpush3.msra.mxu1 %v1626_v7  ;;  %2430 = vmatprep.mubr.msk.f32.mxu1 %vm2481_vm2, %v2480_v61 }
 0x82a   :  { %2424 = vmatprep.subr.mxu1 %v2480_v61 }
 0x82b   :  { %2425 = vmatpush3.msra.mxu1 %v1625_v8 }
 0x82c   :  { %2426 = vmatprep.subr.mxu1 %v2480_v61 }
 0x82d   :  { %2427 = vmatpush3.msra.mxu1 %v1624_v9 }
 0x82e   :  { %2428 = vmatprep.subr.mxu1 %v2480_v61 }
 0x82f   :  { %2429 = vmatpush3.msra.mxu1 %v1623_v32 }
 0x830   :  { %2444 = vmatprep.subr.mxu1 %v2480_v61 }
 0x8e8   :  { %v1619_v19 = vpop.f32.mrf.mxu1 }
 0x8e9   :  { %2431 = vmatmul.mubr.msk.f32.vlgmr.msra.gmra.mxu1 %vm187_vm1, %v1619_v19 }
 0x8ea   :  { %v2421_v20 = vpop.f32.mrf.mxu1  ;;  %2452 = vmatprep.mubr.msk.f32.mxu1 %vm2481_vm2, %v2480_v61  ;;  %2445 = vmatpush3.msra.mxu1 %v1792_v23 }
 0x8eb   :  { %2446 = vmatprep.subr.mxu1 %v2480_v61 }
 0x8ec   :  { %2447 = vmatpush3.msra.mxu1 %v1791_v34 }
 0x8ed   :  { %2448 = vmatprep.subr.mxu1 %v2480_v61 }
 0x8ee   :  { %2449 = vmatpush3.msra.mxu1 %v1790_v46 }
 0x8ef   :  { %2450 = vmatprep.subr.mxu1 %v2480_v61 }
 0x8f0   :  { %2451 = vmatpush3.msra.mxu1 %v1789_v15 }
 0x9a9   :  { %v1696_v27 = vpop.f32.mrf.mxu1 }
 0x9aa   :  { %v1700_v28 = vadd.f32 %v1696_v27, %v1155_v25 }
 0x9ab   :  { %v2432_v29 = vpop.f32.mrf.mxu1 }
 0x9ac   :  { %v1705_v30 = vadd.f32 %v1704_v26, %v1700_v28 }
 0x9ae   :  { %v1706_v31 = vmax.f32 %v1705_v30, 0.0 }
 0x9b0   :  { %2442 = vmatmul.mubr.msk.f32.vlgmr.msra.gmra.mxu0 %vm187_vm1, %v1706_v31 }
 0xa70   :  { %v1784_v38 = vpop.f32.mrf.mxu0 }
 0xa71   :  { %v1785_v39 = vadd.f32 %v1784_v38, %v1714_v37 }
 0xa72   :  { %v2443_v41 = vpop.f32.mrf.mxu0 }
 0xa73   :  { %v1788_v42 = vmax.f32 %v1785_v39, 0.0 }
 0xa75   :  { %2453 = vmatmul.mubr.msk.f32.vlgmr.msra.gmra.mxu1 %vm187_vm1, %v1788_v42 }
 0xb35   :  { %v1867_v61 = vpop.f32.mrf.mxu1 }
 0xb36   :  { %v1868_v44 = vadd.f32 %v1965_v43, %v1867_v61 }
 0xb37   :  { %v2454_v45 = vpop.f32.mrf.mxu1 }
 0xb38   :  { %1871 = vst [vmem:[#allocation2] sm:$0xf] %v1868_v44 }
 0xb39   :  { %2469 = shalt.err (!%p2466_p4)
}
 0xb3a   :  { %1881 = dma.vmem_to_hbm [thread:$0]  %s1879_s20, 64, %s2936_s7, [#allocation3]  }
 0xb3b   :  { %2478 = dma.done.wait [#allocation3], 64  }
 0xb3c   :  { %2479 = vsyncadd [#allocation3], 4294967232 }
 0xb3d   :  { %1885 = vsyncpa [#allocation3], 1 }

</bundles_post_ra>
